<compile_context>
chip_gen: v5e
topology: v5e:2x2
jax: 0.10.0
libtpu: 0.0.40
codegen_flags: <defaults>
</compile_context>

<pallas_src>
import jax
import jax.numpy as jnp
from jax import lax
from jax.experimental import pallas as pl
from jax.experimental.pallas import tpu as pltpu


def _make_kernel(tn, resident):
    def kernel(z_rows_ref, z_cols_ref, out_ref):
        # z_rows_ref: (1, TM, D)                      row tile of Z (native dtype)
        # z_cols_ref: (1, D, TN)  or (1, D, N) when the panel is VMEM-resident
        # out_ref:    (1, TM, TN)
        zr = z_rows_ref[0]                                   # (TM, D)
        if resident:
            j = pl.program_id(2)
            start = pl.multiple_of(j * tn, 128)
            zc = z_cols_ref[0, :, pl.ds(start, tn)]          # (D, TN) slice of panel
        else:
            zc = z_cols_ref[0]                               # (D, TN)

        # (TM, D) x (D, TN): RHS already in native (K, N) orientation for the MXU.
        scores = lax.dot_general(
            zr, zc,
            dimension_numbers=(((1,), (0,)), ((), ())),
            preferred_element_type=jnp.float32,
        )  # (TM, TN) f32

        # sigmoid via a single transcendental (tanh on the EUP slot).
        probs = 0.5 * jnp.tanh(0.5 * scores) + 0.5
        out_ref[0] = probs.astype(out_ref.dtype)

    return kernel


def _pick_tile(n, target):
    """Multiple-of-128 tile <= target; full extent when n already fits."""
    target = max(128, (target // 128) * 128)
    if n <= target:
        return n          # full-extent block (always a legal block dim)
    return target         # fixed tile; grid uses cdiv, edge blocks are masked


def inner_product_decoder(Z, *, out_dtype=None, tm_target=512, tn_target=2048):
    """sigmoid(Z @ Z^T) batched over the leading dim, via a tiled Pallas TPU kernel.

    out_dtype: output dtype (default Z.dtype, matching the PyTorch module).
               Pass jnp.bfloat16 to halve the dominant HBM writeback stream.
    """
    B, N, D = Z.shape
    out_dtype = Z.dtype if out_dtype is None else jnp.dtype(out_dtype)

    TM = _pick_tile(N, tm_target)   # output sublane-axis tile
    TN = _pick_tile(N, tn_target)   # output lane-axis tile (lane-dense)
    gi, gj = pl.cdiv(N, TM), pl.cdiv(N, TN)
    grid = (B, gi, gj)

    in_bytes = jnp.dtype(Z.dtype).itemsize
    out_bytes = jnp.dtype(out_dtype).itemsize

    # Keep the whole per-batch column panel resident in VMEM when it is small
    # and TN divides N (so the in-kernel slice never leaves the buffer).
    resident = (TN < N) and (N % TN == 0) and (N * D * in_bytes <= 2 * 2**20)

    Zt = jnp.swapaxes(Z, 1, 2)  # (B, D, N): one-time O(B*N*D) layout change

    if resident:
        col_spec = pl.BlockSpec((1, D, N), lambda b, i, j: (b, 0, 0))
        col_vmem_bytes = D * N * in_bytes
        col_hbm_bytes = B * D * N * in_bytes            # fetched once per batch elem
    else:
        col_spec = pl.BlockSpec((1, D, TN), lambda b, i, j: (b, 0, j))
        col_vmem_bytes = D * TN * in_bytes
        col_hbm_bytes = B * D * N * in_bytes * gi       # re-read per row-tile

    cost = pl.CostEstimate(
        flops=2 * B * N * N * D,
        transcendentals=B * N * N,
        bytes_accessed=(B * N * D * in_bytes * gj       # row tiles re-read per col-tile
                        + col_hbm_bytes
                        + B * N * N * out_bytes),
    )

    # Double-buffered VMEM footprint; give the compiler explicit headroom but
    # stay under v7x's 64 MiB physical VMEM.
    vmem_est = 2 * (TM * TN * out_bytes + TM * D * in_bytes + col_vmem_bytes)
    vmem_limit = int(min(max(2 * vmem_est, 32 * 2**20), 64 * 2**20))

    return pl.pallas_call(
        _make_kernel(TN, resident),
        out_shape=jax.ShapeDtypeStruct((B, N, N), out_dtype),
        grid_spec=pltpu.PrefetchScalarGridSpec(
            num_scalar_prefetch=0,
            grid=grid,
            in_specs=[
                pl.BlockSpec((1, TM, D), lambda b, i, j: (b, i, 0)),  # row tile of Z
                col_spec,                                             # col tile of Z^T
            ],
            out_specs=pl.BlockSpec((1, TM, TN), lambda b, i, j: (b, i, j)),
        ),
        compiler_params=pltpu.CompilerParams(
            # No reduction axis (D stays whole) -> every grid step is independent.
            dimension_semantics=("parallel", "parallel", "parallel"),
            vmem_limit_bytes=vmem_limit,
        ),
        cost_estimate=cost,
    )(Z, Zt)


def _ref(Z):
    return jax.nn.sigmoid(
        jnp.einsum("bnd,bmd->bnm", Z, Z, precision=lax.Precision.HIGHEST))


if __name__ == "__main__":
    # 1) Small shapes consistent with the module's forward:
    #    Z: [batch_size, num_nodes, n_latent]
    batch_size, num_nodes, n_latent = 2, 8, 32
    key = jax.random.PRNGKey(0)
    Z = jax.random.normal(key, (batch_size, num_nodes, n_latent), dtype=jnp.float32)

    out = jax.block_until_ready(inner_product_decoder(Z))
    assert out.shape == (batch_size, num_nodes, num_nodes)
    assert jnp.allclose(out, _ref(Z), atol=1e-5, rtol=1e-5)

    # 2) Tiled + ragged path (N not a multiple of the tile; edge blocks masked).
    Z2 = jax.random.normal(jax.random.PRNGKey(0), (2, 384, 64), dtype=jnp.float32)
    out2 = jax.block_until_ready(
        inner_product_decoder(Z2, tm_target=128, tn_target=256))
    assert jnp.allclose(out2, _ref(Z2), atol=1e-4, rtol=1e-4)

    # 3) Resident column-panel path (TN | N, small panel kept in VMEM).
    Z3 = jax.random.normal(jax.random.PRNGKey(0), (1, 512, 64), dtype=jnp.float32)
    out3 = jax.block_until_ready(
        inner_product_decoder(Z3, tm_target=256, tn_target=256))
    assert jnp.allclose(out3, _ref(Z3), atol=1e-4, rtol=1e-4)

    # 4) bf16 output (halves the dominant HBM writeback stream).
    out4 = jax.block_until_ready(
        inner_product_decoder(Z2, out_dtype=jnp.bfloat16,
                              tm_target=128, tn_target=256))
    assert out4.dtype == jnp.bfloat16
    assert jnp.allclose(out4.astype(jnp.float32), _ref(Z2), atol=2e-2, rtol=2e-2)

    print("KERNEL_OK")
</pallas_src>

<mosaic_0001>
module attributes {stable_mosaic.version = 11 : i64} {
  func.func @kernel(%arg0: i32, %arg1: i32, %arg2: i32, %arg3: memref<1x8x32xf32, #tpu.memory_space<vmem>>, %arg4: memref<1x32x8xf32, #tpu.memory_space<vmem>>, %arg5: memref<1x8x8xf32, #tpu.memory_space<vmem>>) attributes {dimension_semantics = [#tpu.dimension_semantics<parallel>, #tpu.dimension_semantics<parallel>, #tpu.dimension_semantics<parallel>], iteration_bounds = array<i64: 2, 1, 1>, scalar_prefetch = 0 : i64, scratch_operands = 0 : i64, tpu.core_type = #tpu.core_type<tc>, window_params = [{transform_indices = @transform_0, window_bounds = array<i64: 1, 8, 32>}, {transform_indices = @transform_1, window_bounds = array<i64: 1, 32, 8>}, {transform_indices = @transform_2, window_bounds = array<i64: 1, 8, 8>}]} {
    %c0 = arith.constant 0 : index
    %c0_0 = arith.constant 0 : index
    %c0_1 = arith.constant 0 : index
    %0 = vector.load %arg3[%c0, %c0_0, %c0_1] : memref<1x8x32xf32, #tpu.memory_space<vmem>>, vector<1x8x32xf32>
    %1 = vector.shape_cast %0 : vector<1x8x32xf32> to vector<8x32xf32>
    %c0_2 = arith.constant 0 : index
    %c0_3 = arith.constant 0 : index
    %c0_4 = arith.constant 0 : index
    %2 = vector.load %arg4[%c0_2, %c0_3, %c0_4] : memref<1x32x8xf32, #tpu.memory_space<vmem>>, vector<1x32x8xf32>
    %3 = vector.shape_cast %2 : vector<1x32x8xf32> to vector<32x8xf32>
    %cst = arith.constant dense<0.000000e+00> : vector<8x8xf32>
    %4 = tpu.matmul %1, %3, %cst {dimension_numbers = #tpu.dot_dimension_numbers<[1], [0], [0], [1], [0, 0, 1, 1], [], []>} : vector<8x32xf32>, vector<32x8xf32>, vector<8x8xf32> -> vector<8x8xf32>
    %cst_5 = arith.constant 5.000000e-01 : f32
    %5 = vector.broadcast %cst_5 : f32 to vector<8x8xf32>
    %6 = arith.mulf %5, %4 : vector<8x8xf32>
    %7 = math.tanh %6 : vector<8x8xf32>
    %cst_6 = arith.constant 5.000000e-01 : f32
    %8 = vector.broadcast %cst_6 : f32 to vector<8x8xf32>
    %9 = arith.mulf %8, %7 : vector<8x8xf32>
    %cst_7 = arith.constant 5.000000e-01 : f32
    %10 = vector.broadcast %cst_7 : f32 to vector<8x8xf32>
    %11 = arith.addf %9, %10 : vector<8x8xf32>
    %c0_8 = arith.constant 0 : index
    %c0_9 = arith.constant 0 : index
    %c0_10 = arith.constant 0 : index
    %12 = vector.load %arg5[%c0_8, %c0_9, %c0_10] : memref<1x8x8xf32, #tpu.memory_space<vmem>>, vector<1x8x8xf32>
    %13 = vector.shape_cast %12 : vector<1x8x8xf32> to vector<8x8xf32>
    %14 = vector.shape_cast %11 : vector<8x8xf32> to vector<1x8x8xf32>
    tpu.vector_store %arg5[%c0_8, %c0_9, %c0_10], %14 {strides = array<i32>} : memref<1x8x8xf32, #tpu.memory_space<vmem>>, vector<1x8x8xf32>,
    return
  }
  func.func @transform_0(%arg0: i32, %arg1: i32, %arg2: i32) -> (i32, i32, i32) {
    %c0_i32 = arith.constant 0 : i32
    %c0_i32_0 = arith.constant 0 : i32
    return %arg0, %arg1, %c0_i32 : i32, i32, i32
  }
  func.func @transform_1(%arg0: i32, %arg1: i32, %arg2: i32) -> (i32, i32, i32) {
    %c0_i32 = arith.constant 0 : i32
    %c0_i32_0 = arith.constant 0 : i32
    return %arg0, %c0_i32, %arg2 : i32, i32, i32
  }
  func.func @transform_2(%arg0: i32, %arg1: i32, %arg2: i32) -> (i32, i32, i32) {
    %c0_i32 = arith.constant 0 : i32
    return %arg0, %arg1, %arg2 : i32, i32, i32
  }
}

</mosaic_0001>

<bundles_post_ra>
// kernel: tpu_custom_call.1
= control target key start
LH: loop header
LB: loop body
LE: loop exit
PB: predicated region body
PF: predicated region fallthrough
CT: control target
= control target key end

     0   :  { %7 = vsyncpa [#allocation3], 0  ;;  %s617_s0 = inlined_call_operand.vmem [shape: f32[2,8,32], index: 0, kind: input, shape index: {}]   ;;  %s618_s1 = inlined_call_operand.vmem [shape: f32[2,32,8], index: 1, kind: input, shape index: {}]   ;;  %s619_s2 = inlined_call_operand.hbm [shape: f32[2,8,8], index: 2, kind: output, shape index: {}]  }
   0x1   :  { %9 = vsyncpa [#allocation3 + $0x1], 0  ;;  %s517_s9 = smov 0   ;;  %s519_s10 = smov 0  }
   0x2   :  { %s521_s11 = smov 0   ;;  %s523_s12 = smov 0  }
   0x3   :  { %s525_s13 = smov 0   ;;  %s527_s14 = smov 0  }
   0x4 LB: > { %s350_s15 = sadd.s32 4294967295, %s500_s14   ;;  %s351_s16 = sadd.s32 4294967294, %s500_s14   ;;  %s500_s14 = sphi %s527_s14, %s15_s14   ;;  %s496_s13 = sphi %s525_s13, %s626_s13   ;;  %s492_s12 = sphi %s523_s12, %s625_s12   ;;  %s488_s11 = sphi %s521_s11, %s624_s11   ;;  %s484_s10 = sphi %s519_s10, %s623_s10   ;;  %s480_s9 = sphi %s517_s9, %s622_s9  }
   0x5   : > { %s34_s17 = sadd.s32 1, %s496_s13  ;;  %s101_s18 = sadd.s32 1, %s488_s11 }
   0x6   : > { %p36_p0 = scmp.ge.s32.totalorder %s34_s17, 2  ;;  %p111_p1 = scmp.ne.s32.totalorder %s488_s11, %s484_s10 }
   0x7   : > { %p112_p2 = scmp.eq.s32.totalorder %s350_s15, 1  ;;  %p117_p3 = scmp.ne.s32.totalorder %s484_s10, %s480_s9 }
   0x8   : > { %s628_s17 = smov (%p36_p0, %s34_s17), 0  ;;  %p118_p5 = scmp.eq.s32.totalorder %s351_s16, 1 }
   0x9   : > { %p557_p4 = por %p112_p2, %p111_p1  ;;  %s94_s20 = ssub.s32 %s496_s13, %s628_s17 }
   0xa   : > { %p354_p6 = scmp.ge.s32.totalorder %s500_s14, 1  ;;  %p99_p7 = scmp.eq.s32.totalorder %s94_s20, 0 }
   0xb   : > { %p564_p8 = por %p118_p5, %p117_p3  ;;  %p157_p9 = scmp.lt.s32.totalorder %s500_s14, 3 }
   0xc   : > { %s570_s22 = scalar_select %p99_p7, %s488_s11, %s101_s18  }
   0xd   : > { %p158_p10 = pnand %p354_p6, %p157_p9 }
   0xe   : > { %p189_p11 = scmp.lt.s32.totalorder (!%p158_p10), %s492_s12, 1  ;;  %s186_s4 = sand.u32 (!%p158_p10), 1, %s484_s10  }
   0xf   : > { %161 = sbr.rel (%p158_p10) target bundleno = 174 (0xae), region = 28  ;;  %s355_s5 = sshll.u32 (!%p158_p10), %s186_s4, 3 }
  0x10   : > { %s361_s6 = sshll.u32 (!%p158_p10), %s492_s12, 3  ;;  %s188_s16 = scalar_lea.vmem (!%p158_p10), [#allocation2], %s355_s5 }
  0x11   : > { %s252_s15 = scalar_lea.hbm (!%p158_p10), %s619_s2, %s361_s6  ;;  %s254_s18 = sshll.u32 (!%p158_p10), %s188_s16, 4  ;;  %s255_s18 = int_to_ptr.vmem [resolvable:$true] %s254_s18 }
  0x12   : > { %s256_s20 = sshll.u32 (!%p158_p10), %s252_s15, 4  ;;  %s257_s20 = int_to_ptr.hbm [resolvable:$true] %s256_s20 }
  0x14   : > { %s190_s23 = scalar_select %p189_p11, %s492_s12, 1  ;;  %vm209_vm0 = vcmask 261120   ;;  %vm237_vm1 = vcmask 64512  }
  0x16   : > { %s364_s24 = sshll.u32 %s190_s23, 5  ;;  %s356_s28 = sshll.u32 %s190_s23, 3 }
  0x17   : > { %s203_s27 = scalar_lea.vmem %s618_s1, %s364_s24  ;;  %s195_s3 = scalar_lea.vmem %s617_s0, %s356_s28 }
  0x18   : > { %v208_v0 = vld [vmem:[%s203_s27 + $0x18] sm:$0xff]  ;;  %v207_v1 = vld [vmem:[%s203_s27 + $0x10] sm:$0xff]  ;;  %v206_v2 = vld [vmem:[%s203_s27 + $0x8] sm:$0xff]  ;;  %s240_s23 = scalar_lea.sflag [#allocation3], %s186_s4  ;;  %s436_s24 = sshra.s32 %s257_s20, 4  ;;  %s437_s24 = int_to_ptr.hbm [resolvable:$true] %s436_s24 }
  0x19   : > { %225 = vmatpush.msra.mxu0 %v208_v0  ;;  %v205_v3 = vld [vmem:[%s203_s27] sm:$0xff]  ;;  %s438_s25 = scalar_lea.hbm %s437_s24, 8  ;;  %s442_s27 = scalar_lea.hbm %s619_s2, 16 }
  0x1a   : > { %v204_v4 = vld [vmem:[%s195_s3] sm:$0xff]  ;;  %p439_p12 = scmp.ne.s32.totalorder %s437_s24, %s438_s25  ;;  %p443_p1 = scmp.lt.s32.totalorder %s437_s24, %s619_s2 }
  0x1b   : > { %226 = vmatpush.msra.mxu0 %v207_v1  ;;  %p444_p2 = scmp.lt.s32.totalorder %s442_s27, %s438_s25 }
  0x1c   : > { %p440_p13 = pnand %p439_p12, %p557_p4 }
  0x1d   : > { %227 = vmatpush.msra.mxu0 %v206_v2  ;;  %p445_p3 = por %p444_p2, %p443_p1 }
  0x1e   : > { %p441_p0 = pneg %p440_p13 }
  0x1f   : > { %228 = vmatpush.msra.mxu0 %v205_v3 }
  0x20   : > { %359 = vmatmul.msk.f32.vlgmr.msra.gmra.mxu0 %vm209_vm0, %v204_v4  ;;  %p446_p5 = pnand %p445_p3, %p441_p0 }
  0x9d   : > { %v230_v5 = vpop.f32.mrf.mxu0 }
  0x9e   : > { %v233_v6 = vmul.f32 0.5, %v230_v5 }
  0xa0   : > { %420 = vtanh.f32 %v233_v6 }
  0xa6   : > { %v421_v7 = vpop.eup %420 }
  0xa7   : > { %v235_v8 = vmul.f32 0.5, %v421_v7 }
  0xa9   : > { %v236_v9 = vadd.f32 0.5, %v235_v8 }
  0xab   : > { %238 = vst.msk [vmem:[%s188_s16] sm:$0xff] %vm237_vm1, %v236_v9 }
  0xac   : > { %449 = shalt.err (!%p446_p5)
}
  0xad   : > { %365 = dma.vmem_to_hbm [thread:$0]  (%p557_p4), %s255_s18, 128, %s257_s20, %s240_s23  }
  0xae PF: > { %p371_p6 = scmp.ge.s32.totalorder %s500_s14, 2  ;;  %s268_s30 = sand.u32 1, %s480_s9  }
  0xaf   : > { %s269_s3 = scalar_lea.sflag [#allocation3], %s268_s30 }
  0xb0   : > { %p368_p7 = pnand %p371_p6, %p564_p8 }
  0xb2   : > { %p369_p9 = pneg %p368_p7 }
  0xb4   : > { %475 = dma.done.wait (%p369_p9), %s269_s3, 128  }
  0xb5   : > { %477 = vsyncadd (%p369_p9), %s269_s3, 4294967168  ;;  %s15_s14 = sadd.s32 1, %s500_s14   ;;  %s622_s9 = smov %s484_s10 }
  0xb6   : > { %p12_p10 = scmp.ge.s32.totalorder %s15_s14, 4   ;;  %s623_s10 = smov %s488_s11 }
  0xb7   : > { %s624_s11 = smov %s570_s22  ;;  %s625_s12 = smov %s496_s13 }
  0xb8   : > { %s626_s13 = smov %s628_s17  ;;  %14 = sbr.rel (!%p12_p10) target bundleno = 4 (0x4), region = 66 }
  0xbd   :  { %275 = vsyncpa [#allocation3], 1 }
  0xbe   :  { %277 = vsyncpa [#allocation3 + $0x1], 1 }

</bundles_post_ra>
